<compile_context>
chip_gen: v7x
topology: tpu7x:2x2x1
jax: 0.10.0
libtpu: 0.0.40
codegen_flags: <defaults>
</compile_context>

<pallas_src>
import functools

import jax
import jax.numpy as jnp
from jax.experimental import pallas as pl
from jax.experimental.pallas import tpu as pltpu


def _scale_kernel(p_ref, x_ref, o_ref):
    # p_ref: (1, 1) float32 scalar resident in SMEM; x_ref/o_ref: (tr, cols)
    # VMEM tiles.  The scalar cast runs on the scalar unit (free); the vector
    # path is a single unmasked vld -> vmul -> vst per vreg.  Purely HBM-bound.
    o_ref[...] = x_ref[...] * p_ref[0, 0].astype(x_ref.dtype)


def _choose_cols(n_elems: int) -> int | None:
    """Largest lane-dense width (multiple of 128, <= 4096) dividing n_elems."""
    for cols in (4096, 2048, 1024, 512, 256, 128):
        if n_elems % cols == 0:
            return cols
    return None


def mock_model_forward(x: jax.Array, param: jax.Array, *,
                       block_bytes: int = 8 * 1024 * 1024,
                       min_pallas_bytes: int = 2 * 1024 * 1024,
                       alias_input: bool = False) -> jax.Array:
    """Pallas implementation of MockModel.forward with stub_forward = x * param.

    alias_input=True adds input_output_aliases={1: 0}; only use it when x is
    donated at the jit boundary (otherwise XLA inserts a defensive copy).
    """
    orig_shape = x.shape
    n = x.size
    itemsize = jnp.dtype(x.dtype).itemsize
    cols = _choose_cols(n)

    # Fast paths:
    #  - tiny inputs: pallas_call fixed launch/DMA-setup cost dwarfs the work.
    #  - n % 128 != 0: no lane-dense layout possible.
    # TODO(synk): integer x truncates param before the multiply (differs from
    # PyTorch type promotion); fine for the ones([1]) stub.
    if cols is None or n * itemsize < min_pallas_bytes:
        return x * param.astype(x.dtype)[0]

    rows = n // cols
    x2d = x.reshape(rows, cols)                     # lane-dense slab
    p2d = param.reshape(1, 1).astype(jnp.float32)   # scalar stays f32 in SMEM

    # Dtype-aware sublane floor: 8 for f32, 16 for bf16, 32 for int8/fp8.
    floor = 8 * max(1, 4 // itemsize)

    # Row-tile size: ~block_bytes per block, multiple of the sublane floor.
    bytes_per_row = cols * itemsize
    tr = max(floor, (block_bytes // bytes_per_row) // floor * floor)
    if tr >= rows:
        if rows >= 2 * floor:
            # Split into >= 2 blocks so both of v7x's TensorCores stream HBM.
            tr = max(floor, (rows // 2) // floor * floor)
        else:
            tr = rows                               # block dim == full dim is legal
    else:
        # Same block count, but split rows as evenly as possible (avoids a
        # tiny ragged final block with masked stores when rows permit).
        n_blocks = pl.cdiv(rows, tr)
        tr = min(tr, pl.cdiv(pl.cdiv(rows, n_blocks), floor) * floor)

    grid = (pl.cdiv(rows, tr),)

    call_kwargs = {}
    if alias_input:
        call_kwargs["input_output_aliases"] = {1: 0}   # x2d (input 1) -> output 0

    out2d = pl.pallas_call(
        _scale_kernel,
        out_shape=jax.ShapeDtypeStruct(x2d.shape, x2d.dtype),
        grid=grid,
        in_specs=[
            pl.BlockSpec(memory_space=pltpu.MemorySpace.SMEM),   # param scalar (resident)
            pl.BlockSpec((tr, cols), lambda i: (i, 0)),          # row tile of x
        ],
        out_specs=pl.BlockSpec((tr, cols), lambda i: (i, 0)),
        compiler_params=pltpu.CompilerParams(
            # Independent blocks -> parallel: lets v7x shard across its 2 TCs.
            dimension_semantics=("parallel",),
            # 8 MiB blocks, double-buffered in+out ~= 32 MiB: 48 MiB gives
            # headroom and stays inside v7x's 64 MiB physical VMEM.
            vmem_limit_bytes=48 * 1024 * 1024,
        ),
        # Memory-bound hint for XLA's scheduler around the custom call.
        cost_estimate=pl.CostEstimate(
            flops=n, transcendentals=0, bytes_accessed=2 * n * itemsize),
        **call_kwargs,
    )(p2d, x2d)

    return out2d.reshape(orig_shape)


if __name__ == "__main__":
    key = jax.random.PRNGKey(0)

    # Deterministic parameter, matching torch.nn.Parameter(torch.ones([1])).
    param = jnp.ones((1,), dtype=jnp.float32)

    # 1) Tiny NCHW activation: exercises the small-input jnp fast path.
    x = jax.random.normal(key, (2, 4, 16, 16), dtype=jnp.float32)
    out = jax.block_until_ready(mock_model_forward(x, param))
    assert out.shape == x.shape and out.dtype == x.dtype
    assert jnp.allclose(out, x * param[0], atol=1e-6, rtol=1e-6)

    # 2) Force the Pallas path with a small block budget: multi-block grid
    #    (rows=22, tr=8 -> blocks 8/8/6) with a ragged, masked final block.
    x2 = jax.random.normal(jax.random.PRNGKey(1), (2, 4, 88, 128), dtype=jnp.float32)
    out2 = jax.block_until_ready(
        mock_model_forward(x2, param, block_bytes=128 * 1024, min_pallas_bytes=0))
    assert jnp.allclose(out2, x2 * param[0], atol=1e-6, rtol=1e-6)

    # 3) bf16 path: dtype-aware sublane floor (16), two even blocks.
    x3 = jax.random.normal(jax.random.PRNGKey(2), (2, 4, 128, 128), dtype=jnp.bfloat16)
    out3 = jax.block_until_ready(
        mock_model_forward(x3, param, block_bytes=128 * 1024, min_pallas_bytes=0))
    assert out3.shape == x3.shape and out3.dtype == jnp.bfloat16
    assert jnp.allclose(out3.astype(jnp.float32),
                        x3.astype(jnp.float32) * param[0], atol=1e-2, rtol=1e-2)

    # 4) Aliased output + donated input under jit: output reuses x's HBM buffer.
    x4 = jax.random.normal(jax.random.PRNGKey(3), (2, 4, 64, 128), dtype=jnp.float32)
    ref4 = x4 * param[0]                             # compute before donating x4
    fwd_donated = jax.jit(
        functools.partial(mock_model_forward,
                          block_bytes=128 * 1024, min_pallas_bytes=0,
                          alias_input=True),
        donate_argnums=(0,))
    out4 = jax.block_until_ready(fwd_donated(x4, param))
    assert jnp.allclose(out4, ref4, atol=1e-6, rtol=1e-6)

    print("KERNEL_OK")
</pallas_src>

<mosaic_0001>
module attributes {stable_mosaic.version = 11 : i64} {
  func.func @_scale_kernel(%arg0: i32, %arg1: memref<1x1xf32, #tpu.memory_space<smem>>, %arg2: memref<8x4096xf32, #tpu.memory_space<vmem>>, %arg3: memref<8x4096xf32, #tpu.memory_space<vmem>>) attributes {dimension_semantics = [#tpu.dimension_semantics<parallel>], iteration_bounds = array<i64: 3>, scalar_prefetch = 0 : i64, scratch_operands = 0 : i64, tpu.core_type = #tpu.core_type<tc>, window_params = [{transform_indices = @transform_0, window_bounds = array<i64: 1, 1>}, {transform_indices = @transform_1, window_bounds = array<i64: 8, 4096>}, {transform_indices = @transform_2, window_bounds = array<i64: 8, 4096>}]} {
    %c0 = arith.constant 0 : index
    %c0_0 = arith.constant 0 : index
    %0 = vector.load %arg2[%c0, %c0_0] : memref<8x4096xf32, #tpu.memory_space<vmem>>, vector<8x4096xf32>
    %c0_1 = arith.constant 0 : index
    %c0_2 = arith.constant 0 : index
    %1 = memref.load %arg1[%c0_1, %c0_2] : memref<1x1xf32, #tpu.memory_space<smem>>
    %2 = vector.broadcast %1 : f32 to vector<8x4096xf32>
    %3 = arith.mulf %0, %2 : vector<8x4096xf32>
    %c0_3 = arith.constant 0 : index
    %c0_4 = arith.constant 0 : index
    %4 = vector.load %arg3[%c0_3, %c0_4] : memref<8x4096xf32, #tpu.memory_space<vmem>>, vector<8x4096xf32>
    tpu.vector_store %arg3[%c0_3, %c0_4], %3 {strides = array<i32>} : memref<8x4096xf32, #tpu.memory_space<vmem>>, vector<8x4096xf32>,
    return
  }
  func.func @transform_0(%arg0: i32) -> (i32, i32) {
    %c0_i32 = arith.constant 0 : i32
    %c0_i32_0 = arith.constant 0 : i32
    %c0_i32_1 = arith.constant 0 : i32
    return %c0_i32, %c0_i32_0 : i32, i32
  }
  func.func @transform_1(%arg0: i32) -> (i32, i32) {
    %c0_i32 = arith.constant 0 : i32
    %c0_i32_0 = arith.constant 0 : i32
    return %arg0, %c0_i32 : i32, i32
  }
  func.func @transform_2(%arg0: i32) -> (i32, i32) {
    %c0_i32 = arith.constant 0 : i32
    %c0_i32_0 = arith.constant 0 : i32
    return %arg0, %c0_i32 : i32, i32
  }
}

</mosaic_0001>

<bundles_post_ra>
// kernel: tpu_custom_call.1
= control target key start
LH: loop header
LB: loop body
LE: loop exit
PB: predicated region body
PF: predicated region fallthrough
CT: control target
= control target key end

     0   :  { %s786_s0 = inlined_call_operand.<no memory space> [shape: f32[1,1], index: 0, kind: input, shape index: {}]   ;;  %s787_s1 = inlined_call_operand.hbm [shape: f32[22,4096], index: 1, kind: input, shape index: {}]   ;;  %s788_s2 = inlined_call_operand.hbm [shape: f32[22,4096], index: 2, kind: output, shape index: {}]  }
   0x1   :  { %7 = sst [smem:[#allocation2]] %s786_s0 }
   0x2   :  { %8 = vsyncpa [#allocation4], 0 }
   0x3   :  { %10 = vsyncpa [#allocation4 + $0x1], 0 }
   0x4   :  { %11 = vsyncpa [#allocation5], 0 }
   0x5   :  { %13 = vsyncpa [#allocation5 + $0x1], 0  ;;  %s524_s11 = smov 0   ;;  %s526_s12 = smov 0  }
   0x6   :  { %s528_s13 = smov 0   ;;  %s530_s14 = smov 0  }
   0x7 LB: > { %s545_s0 = sadd.s32 4294967295, %s502_s14   ;;  %s344_s15 = sadd.s32 4294967294, %s502_s14   ;;  %s502_s14 = sphi %s530_s14, %s802_s14   ;;  %s498_s13 = sphi %s528_s13, %s801_s13   ;;  %s494_s12 = sphi %s526_s12, %s800_s12   ;;  %s490_s11 = sphi %s524_s11, %s799_s11  }
   0x8   : > { %s549_s16 = sadd.s32 1, %s502_s14   ;;  %s47_s17 = sadd.s32 1, %s498_s13 }
   0x9   : > { %s44_s18 = ssub.s32 %s502_s14, %s549_s16  ;;  %p54_p0 = scmp.ne.s32.totalorder %s498_s13, %s494_s12 }
   0xa   : > { %p45_p1 = scmp.eq.s32.totalorder %s44_s18, 0  ;;  %p55_p2 = scmp.eq.s32.totalorder %s502_s14, 0 }
   0xb   : > { %p60_p3 = scmp.ne.s32.totalorder %s494_s12, %s490_s11  ;;  %p61_p4 = scmp.eq.s32.totalorder %s545_s0, 0 }
   0xc   : > { %s561_s19 = scalar_select %p45_p1, %s498_s13, %s47_s17  }
   0xd   : > { %p563_p5 = por %p55_p2, %p54_p0  ;;  %p567_p6 = por %p61_p4, %p60_p3 }
   0xe   : > { %p84_p7 = scmp.eq.s32.totalorder %s545_s0, 2  ;;  %p90_p8 = scmp.eq.s32.totalorder %s344_s15, 2 }
   0xf   : > { %p372_p9 = scmp.lt.s32.totalorder %s502_s14, 3  ;;  %s113_s24 = sand.u32 1, %s498_s13  }
  0x10   : > { %p573_p10 = por %p84_p7, %p54_p0  ;;  %p577_p11 = por %p90_p8, %p60_p3 }
  0x11   : > { %s358_s25 = sshll.u32 %s502_s14, 12  ;;  %s347_s26 = sshll.u32 %s113_s24, 8 }
  0x12   : > { %s792_s22 = scalar_select %p573_p10, 1, 0 }
  0x13   : > { %s793_s23 = scalar_select %p577_p11, 1, 0 }
  0x14   : > { %s586_s29 = scalar_lea.hbm %s787_s1, %s358_s25  ;;  %s117_s30 = scalar_lea.vmem [#allocation3], %s347_s26 }
  0x15   : > { %s125_s3 = sshll.u32 %s117_s30, 4  ;;  %p590_p12 = pnand %p372_p9, %p563_p5  ;;  %s594_s3 = int_to_ptr.vmem [resolvable:$true] %s125_s3 }
  0x16   : > { %s114_s5 = scalar_lea.sflag [#allocation4], %s113_s24  ;;  %s406_s6 = scalar_lea.hbm %s586_s29, 4096 }
  0x17   : > { %p407_p1 = scmp.ne.s32.totalorder %s586_s29, %s406_s6  ;;  %p408_p2 = pneg %p590_p12 }
  0x18   : > { %s411_s9 = scalar_lea.hbm %s787_s1, 12288  ;;  %p412_p5 = scmp.lt.u32.totalorder %s586_s29, %s787_s1 }
  0x19   : > { %p409_p3 = pnand %p408_p2, %p407_p1  ;;  %p413_p7 = scmp.lt.u32.totalorder %s411_s9, %s406_s6 }
  0x1a   : > { %p415_p9 = scmp.lt.u32.totalorder %s406_s6, %s586_s29 }
  0x1b   : > { %p410_p4 = pneg %p409_p3  ;;  %p414_p8 = por %p413_p7, %p412_p5 }
  0x1d   : > { %p416_p13 = por %p415_p9, %p414_p8 }
  0x1f   : > { %p417_p0 = pnand %p416_p13, %p410_p4 }
  0x21   : > { %420 = shalt.err (!%p417_p0)
}
  0x22   : > { %s421_s17 = scalar_lea.vmem %s594_s3, 4096  ;;  %s504_s18 = smov [#allocation3]  }
  0x23   : > { %p422_p1 = scmp.ne.s32.totalorder %s594_s3, %s421_s17  ;;  %s426_s20 = sshll.u32 %s504_s18, 4  ;;  %s427_s20 = int_to_ptr.vmem [resolvable:$false] %s426_s20 }
  0x24   : > { %s428_s24 = scalar_lea.vmem %s427_s20, 8192  ;;  %p429_p10 = scmp.lt.s32.totalorder %s594_s3, %s427_s20 }
  0x25   : > { %p424_p3 = pnand %p422_p1, %p408_p2  ;;  %p430_p5 = scmp.lt.s32.totalorder %s428_s24, %s421_s17 }
  0x27   : > { %p425_p11 = pneg %p424_p3  ;;  %p431_p7 = por %p430_p5, %p429_p10 }
  0x29   : > { %p432_p8 = pnand %p431_p7, %p425_p11 }
  0x2b   : > { %435 = shalt.err (!%p432_p8)
}
  0x2c   : > { %367 = dma.hbm_to_vmem [thread:$0]  (!%p590_p12), %s586_s29, 4096, %s594_s3, %s114_s5  }
  0x2d   : > { %p795_p13 = scmp.lt.s32.totalorder %s502_s14, 4  ;;  %p796_p0 = scmp.ge.s32.totalorder %s502_s14, 1 }
  0x2f   : > { %p131_p2 = pnand %p796_p0, %p795_p13 }
  0x30   : > { %s628_s25 = sand.u32 (!%p131_p2), 1, %s494_s12  }
  0x31   : > { %134 = sbr.rel (%p131_p2) target bundleno = 95 (0x5f), region = 28  ;;  %s351_s26 = sshll.u32 (!%p131_p2), %s628_s25, 8 }
  0x32   : > { %s137_s27 = scalar_lea.sflag (!%p131_p2), [#allocation4], %s628_s25  ;;  %s632_s28 = scalar_lea.vmem (!%p131_p2), [#allocation3], %s351_s26 }
  0x38   : > { %481 = dma.done.wait (%p567_p6), %s137_s27, 4096  }
  0x39   : > { %483 = vsyncadd (%p567_p6), %s137_s27, 4294963200  ;;  %s193_s29 = sld [smem:[#allocation2]]  ;;  %v161_v0 = vld [vmem:[%s632_s28] sm:$0xff]  ;;  %v162_v2 = vld [vmem:[%s632_s28 + $0x8] sm:$0xff]  ;;  %s655_s21 = scalar_lea.vmem [#allocation6], %s351_s26 }
  0x3a   : > { %v163_v3 = vld [vmem:[%s632_s28 + $0x10] sm:$0xff]  ;;  %v164_v7 = vld [vmem:[%s632_s28 + $0x18] sm:$0xff]  ;;  %v165_v8 = vld [vmem:[%s632_s28 + $0x20] sm:$0xff]  ;;  %s359_s30 = sshll.u32 %s545_s0, 12  ;;  %s274_s3 = sshll.u32 %s655_s21, 4  ;;  %s740_s3 = int_to_ptr.vmem [resolvable:$true] %s274_s3 }
  0x3b   : > { %v166_v9 = vld [vmem:[%s632_s28 + $0x28] sm:$0xff]  ;;  %v167_v13 = vld [vmem:[%s632_s28 + $0x30] sm:$0xff]  ;;  %v168_v14 = vld [vmem:[%s632_s28 + $0x38] sm:$0xff]  ;;  %s738_s5 = scalar_lea.hbm %s788_s2, %s359_s30  ;;  %s260_s6 = scalar_lea.sflag [#allocation5], %s628_s25 }
  0x3c   : > { %v169_v15 = vld [vmem:[%s632_s28 + $0x40] sm:$0xff]  ;;  %v170_v19 = vld [vmem:[%s632_s28 + $0x48] sm:$0xff]  ;;  %v171_v20 = vld [vmem:[%s632_s28 + $0x50] sm:$0xff]  ;;  %s436_s7 = scalar_lea.vmem %s740_s3, 4096  ;;  %p797_p10 = scmp.ne.s32.totalorder %s792_s22, 0 }
  0x3d   : > { %v172_v21 = vld [vmem:[%s632_s28 + $0x58] sm:$0xff]  ;;  %v173_v25 = vld [vmem:[%s632_s28 + $0x60] sm:$0xff]  ;;  %v174_v26 = vld [vmem:[%s632_s28 + $0x68] sm:$0xff]  ;;  %p437_p6 = scmp.ne.s32.totalorder %s740_s3, %s436_s7  ;;  %s505_s8 = smov [#allocation6]  }
  0x3e   : > { %v175_v27 = vld [vmem:[%s632_s28 + $0x70] sm:$0xff]  ;;  %v176_v31 = vld [vmem:[%s632_s28 + $0x78] sm:$0xff]  ;;  %v177_v32 = vld [vmem:[%s632_s28 + $0x80] sm:$0xff]  ;;  %s440_s9 = sshll.u32 %s505_s8, 4  ;;  %s441_s9 = int_to_ptr.vmem [resolvable:$false] %s440_s9 }
  0x3f   : > { %v639_v1 = vstv %s193_s29  ;;  %v178_v33 = vld [vmem:[%s632_s28 + $0x88] sm:$0xff]  ;;  %v179_v37 = vld [vmem:[%s632_s28 + $0x90] sm:$0xff]  ;;  %v180_v38 = vld [vmem:[%s632_s28 + $0x98] sm:$0xff]  ;;  %p438_p11 = pnand %p437_p6, %p797_p10  ;;  %s442_s10 = scalar_lea.vmem %s441_s9, 8192 }
  0x40   : > { %v195_v4 = vmul.f32 %v639_v1, %v161_v0  ;;  %v196_v5 = vmul.f32 %v639_v1, %v162_v2  ;;  %v197_v6 = vmul.f32 %v639_v1, %v163_v3  ;;  %v198_v10 = vmul.f32 %v639_v1, %v164_v7  ;;  %v181_v39 = vld [vmem:[%s632_s28 + $0xa0] sm:$0xff]  ;;  %v182_v43 = vld [vmem:[%s632_s28 + $0xa8] sm:$0xff]  ;;  %v183_v44 = vld [vmem:[%s632_s28 + $0xb0] sm:$0xff]  ;;  %p443_p4 = scmp.lt.s32.totalorder %s740_s3, %s441_s9  ;;  %p444_p9 = scmp.lt.s32.totalorder %s442_s10, %s436_s7 }
  0x41   : > { %v199_v11 = vmul.f32 %v639_v1, %v165_v8  ;;  %v200_v12 = vmul.f32 %v639_v1, %v166_v9  ;;  %v201_v16 = vmul.f32 %v639_v1, %v167_v13  ;;  %v202_v17 = vmul.f32 %v639_v1, %v168_v14  ;;  %v184_v45 = vld [vmem:[%s632_s28 + $0xb8] sm:$0xff]  ;;  %v185_v49 = vld [vmem:[%s632_s28 + $0xc0] sm:$0xff]  ;;  %v186_v50 = vld [vmem:[%s632_s28 + $0xc8] sm:$0xff]  ;;  %p439_p12 = pneg %p438_p11 }
  0x42   : > { %227 = vst [vmem:[%s655_s21] sm:$0xff] %v195_v4  ;;  %228 = vst [vmem:[%s655_s21 + $0x8] sm:$0xff] %v196_v5  ;;  %v203_v18 = vmul.f32 %v639_v1, %v169_v15  ;;  %v204_v22 = vmul.f32 %v639_v1, %v170_v19  ;;  %v205_v23 = vmul.f32 %v639_v1, %v171_v20  ;;  %v187_v51 = vld [vmem:[%s632_s28 + $0xd0] sm:$0xff]  ;;  %v188_v55 = vld [vmem:[%s632_s28 + $0xd8] sm:$0xff]  ;;  %p445_p1 = por %p444_p9, %p443_p4 }
  0x43   : > { %229 = vst [vmem:[%s655_s21 + $0x10] sm:$0xff] %v197_v6  ;;  %230 = vst [vmem:[%s655_s21 + $0x18] sm:$0xff] %v198_v10  ;;  %v206_v24 = vmul.f32 %v639_v1, %v172_v21  ;;  %v207_v28 = vmul.f32 %v639_v1, %v173_v25  ;;  %v208_v29 = vmul.f32 %v639_v1, %v174_v26  ;;  %v189_v56 = vld [vmem:[%s632_s28 + $0xe0] sm:$0xff]  ;;  %v190_v57 = vld [vmem:[%s632_s28 + $0xe8] sm:$0xff] }
  0x44   : > { %231 = vst [vmem:[%s655_s21 + $0x20] sm:$0xff] %v199_v11  ;;  %232 = vst [vmem:[%s655_s21 + $0x28] sm:$0xff] %v200_v12  ;;  %v209_v30 = vmul.f32 %v639_v1, %v175_v27  ;;  %v210_v34 = vmul.f32 %v639_v1, %v176_v31  ;;  %v211_v35 = vmul.f32 %v639_v1, %v177_v32  ;;  %v191_v61 = vld [vmem:[%s632_s28 + $0xf0] sm:$0xff]  ;;  %v192_v62 = vld [vmem:[%s632_s28 + $0xf8] sm:$0xff]  ;;  %p446_p3 = pnand %p445_p1, %p439_p12 }
  0x45   : > { %233 = vst [vmem:[%s655_s21 + $0x30] sm:$0xff] %v201_v16  ;;  %234 = vst [vmem:[%s655_s21 + $0x38] sm:$0xff] %v202_v17  ;;  %v212_v36 = vmul.f32 %v639_v1, %v178_v33  ;;  %v213_v40 = vmul.f32 %v639_v1, %v179_v37  ;;  %v214_v41 = vmul.f32 %v639_v1, %v180_v38 }
  0x46   : > { %235 = vst [vmem:[%s655_s21 + $0x40] sm:$0xff] %v203_v18  ;;  %236 = vst [vmem:[%s655_s21 + $0x48] sm:$0xff] %v204_v22  ;;  %v215_v42 = vmul.f32 %v639_v1, %v181_v39  ;;  %v216_v46 = vmul.f32 %v639_v1, %v182_v43  ;;  %v217_v47 = vmul.f32 %v639_v1, %v183_v44 }
  0x47   : > { %237 = vst [vmem:[%s655_s21 + $0x50] sm:$0xff] %v205_v23  ;;  %238 = vst [vmem:[%s655_s21 + $0x58] sm:$0xff] %v206_v24  ;;  %v218_v48 = vmul.f32 %v639_v1, %v184_v45  ;;  %v219_v52 = vmul.f32 %v639_v1, %v185_v49  ;;  %v220_v53 = vmul.f32 %v639_v1, %v186_v50 }
  0x48   : > { %239 = vst [vmem:[%s655_s21 + $0x60] sm:$0xff] %v207_v28  ;;  %240 = vst [vmem:[%s655_s21 + $0x68] sm:$0xff] %v208_v29  ;;  %v221_v54 = vmul.f32 %v639_v1, %v187_v51  ;;  %v222_v58 = vmul.f32 %v639_v1, %v188_v55  ;;  %v223_v59 = vmul.f32 %v639_v1, %v189_v56 }
  0x49   : > { %241 = vst [vmem:[%s655_s21 + $0x70] sm:$0xff] %v209_v30  ;;  %242 = vst [vmem:[%s655_s21 + $0x78] sm:$0xff] %v210_v34  ;;  %v224_v60 = vmul.f32 %v639_v1, %v190_v57  ;;  %v225_v63 = vmul.f32 %v639_v1, %v191_v61  ;;  %v226_v0 = vmul.f32 %v639_v1, %v192_v62 }
  0x4a   : > { %243 = vst [vmem:[%s655_s21 + $0x80] sm:$0xff] %v211_v35  ;;  %244 = vst [vmem:[%s655_s21 + $0x88] sm:$0xff] %v212_v36 }
  0x4b   : > { %245 = vst [vmem:[%s655_s21 + $0x90] sm:$0xff] %v213_v40  ;;  %246 = vst [vmem:[%s655_s21 + $0x98] sm:$0xff] %v214_v41 }
  0x4c   : > { %247 = vst [vmem:[%s655_s21 + $0xa0] sm:$0xff] %v215_v42  ;;  %248 = vst [vmem:[%s655_s21 + $0xa8] sm:$0xff] %v216_v46 }
  0x4d   : > { %249 = vst [vmem:[%s655_s21 + $0xb0] sm:$0xff] %v217_v47  ;;  %250 = vst [vmem:[%s655_s21 + $0xb8] sm:$0xff] %v218_v48 }
  0x4e   : > { %251 = vst [vmem:[%s655_s21 + $0xc0] sm:$0xff] %v219_v52  ;;  %252 = vst [vmem:[%s655_s21 + $0xc8] sm:$0xff] %v220_v53 }
  0x4f   : > { %253 = vst [vmem:[%s655_s21 + $0xd0] sm:$0xff] %v221_v54  ;;  %254 = vst [vmem:[%s655_s21 + $0xd8] sm:$0xff] %v222_v58 }
  0x50   : > { %255 = vst [vmem:[%s655_s21 + $0xe0] sm:$0xff] %v223_v59  ;;  %256 = vst [vmem:[%s655_s21 + $0xe8] sm:$0xff] %v224_v60 }
  0x51   : > { %257 = vst [vmem:[%s655_s21 + $0xf0] sm:$0xff] %v225_v63  ;;  %258 = vst [vmem:[%s655_s21 + $0xf8] sm:$0xff] %v226_v0 }
  0x52   : > { %449 = shalt.err (!%p446_p3)
}
  0x53   : > { %s450_s15 = scalar_lea.hbm %s738_s5, 4096  ;;  %s454_s20 = scalar_lea.hbm %s788_s2, 12288 }
  0x54   : > { %p451_p5 = scmp.ne.s32.totalorder %s738_s5, %s450_s15  ;;  %p455_p13 = scmp.lt.u32.totalorder %s738_s5, %s788_s2 }
  0x55   : > { %p456_p0 = scmp.lt.u32.totalorder %s454_s20, %s450_s15  ;;  %p458_p6 = scmp.lt.u32.totalorder %s450_s15, %s738_s5 }
  0x56   : > { %p452_p7 = pnand %p451_p5, %p797_p10 }
  0x57   : > { %p457_p2 = por %p456_p0, %p455_p13 }
  0x58   : > { %p453_p8 = pneg %p452_p7 }
  0x59   : > { %p459_p11 = por %p458_p6, %p457_p2 }
  0x5b   : > { %p460_p12 = pnand %p459_p11, %p453_p8 }
  0x5d   : > { %463 = shalt.err (!%p460_p12)
}
  0x5e   : > { %362 = dma.vmem_to_hbm [thread:$0]  (%p797_p10), %s740_s3, 4096, %s738_s5, %s260_s6  }
  0x5f PF: > { %p373_p4 = scmp.ge.s32.totalorder %s502_s14, 2  ;;  %s286_s26 = sand.u32 1, %s490_s11  }
  0x60   : > { %p798_p9 = scmp.ne.s32.totalorder %s793_s23, 0  ;;  %s287_s27 = scalar_lea.sflag [#allocation5], %s286_s26 }
  0x62   : > { %p369_p1 = pnand %p373_p4, %p798_p9 }
  0x64   : > { %485 = dma.done.wait (!%p369_p1), %s287_s27, 4096  }
  0x65   : > { %487 = vsyncadd (!%p369_p1), %s287_s27, 4294963200  ;;  %p16_p3 = scmp.ge.s32.totalorder %s549_s16, 5   ;;  %s799_s11 = smov %s494_s12 }
  0x66   : > { %s800_s12 = smov %s498_s13  ;;  %s801_s13 = smov %s561_s19 }
  0x67   : > { %s802_s14 = smov %s549_s16  ;;  %18 = sbr.rel (!%p16_p3) target bundleno = 7 (0x7), region = 73 }
  0x6e   :  { %292 = vsyncpa [#allocation4], 1 }
  0x6f   :  { %294 = vsyncpa [#allocation4 + $0x1], 1 }
  0x70   :  { %295 = vsyncpa [#allocation5], 1 }
  0x71   :  { %297 = vsyncpa [#allocation5 + $0x1], 1 }

</bundles_post_ra>
